<compile_context>
chip_gen: v7x
topology: tpu7x:2x2x1
jax: 0.10.0
libtpu: 0.0.40
codegen_flags: <defaults>
</compile_context>

<pallas_src>
import functools

import jax
import jax.numpy as jnp
from jax import lax
from jax.experimental import pallas as pl
from jax.experimental.pallas import tpu as pltpu


_NEG_BIG = -1e30  # finite "-inf": masked lanes / initial maxes never make NaNs


def _round_up(x, m):
    return ((x + m - 1) // m) * m


def _default_num_parallel():
    """2 on dual-TensorCore chips (v7x), else 1. Defensive: never raises."""
    names = []
    try:
        info = pltpu.get_tpu_info()
        names.append(str(getattr(info, "chip_version", "")))
    except Exception:
        pass
    try:
        names.append(str(jax.devices()[0].device_kind))
    except Exception:
        pass
    s = " ".join(names).lower()
    return 2 if ("v7" in s or "7x" in s) else 1


def _vmem_budget_bytes():
    """Generation-aware budget: 0.6 x physical VMEM, capped at 80 MiB."""
    try:
        phys = pltpu.get_tpu_info().vmem_capacity_bytes
    except Exception:
        phys = 64 * 1024 * 1024          # conservative fallback (v7x-safe)
    return min((phys * 3) // 5, 80 * 1024 * 1024)


def _choose_tile_c(num_classes, row_align, elems_budget, max_tile_c):
    """Pick the class-chunk width.  Whole row if it fits; else a multiple of
    128, preferring a divisor of C (within 2x) so the column mask compiles
    away."""
    cap = min(num_classes, max(1, elems_budget // row_align))
    if max_tile_c is not None:
        cap = min(cap, int(max_tile_c))
    if cap >= num_classes or num_classes <= 128:
        return num_classes
    cap = max(128, (cap // 128) * 128)
    for cand in range(cap, max(127, cap // 2 - 1), -128):
        if num_classes % cand == 0:
            return cand
    return cap


def _kd_loss_kernel(x_ref, t_ref, o_ref,
                    mx_ref, mt_ref, xs_ref, ts_ref, w_ref, acc_ref, *,
                    temp_factor, n_rows, num_classes, tile_n, tile_c,
                    blocks_per_core, needs_row_mask, needs_col_mask):
    """Grid = (parallel core axis, row-block axis, class-chunk axis).

    Streaming per-row state lives in (tile_n, 1) f32 scratch; each class
    chunk rescales + accumulates it.  On the last class chunk the per-row KL
    is formed, (optionally) row-masked and added to the per-core accumulator;
    the epilogue does one cross-sublane reduce, applies T^2/N once, and
    writes a lane-dense (8, 128) output block for this core.
    """
    c = pl.program_id(0)          # parallel (core) axis
    i = pl.program_id(1)          # row-block axis (arbitrary)
    j = pl.program_id(2)          # class-chunk axis (arbitrary, innermost)
    n_i = pl.num_programs(1)
    n_j = pl.num_programs(2)

    start_row = (c * blocks_per_core + i) * tile_n
    # Clamped duplicate blocks (cdiv padding of the row grid) are fully
    # out-of-range: skip all compute on them (the DMA is unavoidable).
    row_block_valid = start_row < n_rows

    @pl.when(jnp.logical_and(i == 0, j == 0))
    def _init_acc():
        acc_ref[...] = jnp.zeros_like(acc_ref)

    @pl.when(jnp.logical_and(row_block_valid, j == 0))
    def _init_state():
        mx_ref[...] = jnp.full_like(mx_ref, _NEG_BIG)
        mt_ref[...] = jnp.full_like(mt_ref, _NEG_BIG)
        xs_ref[...] = jnp.zeros_like(xs_ref)
        ts_ref[...] = jnp.zeros_like(ts_ref)
        w_ref[...] = jnp.zeros_like(w_ref)

    @pl.when(row_block_valid)
    def _stream():
        inv_t = 1.0 / temp_factor
        x = x_ref[...].astype(jnp.float32) * inv_t     # student logits / T
        t = t_ref[...].astype(jnp.float32) * inv_t     # teacher logits / T

        if needs_col_mask:
            # Only the last class chunk can be partial; with a finite -1e30
            # mask value exp() underflows to exactly 0 and (t - x) == 0, so
            # masked lanes contribute nothing to any sum.
            col = lax.broadcasted_iota(jnp.int32, (tile_n, tile_c), 1)
            col_ok = col < (num_classes - j * tile_c)
            x = jnp.where(col_ok, x, jnp.float32(_NEG_BIG))
            t = jnp.where(col_ok, t, jnp.float32(_NEG_BIG))

        mx_new = jnp.maximum(mx_ref[...], jnp.max(x, axis=1, keepdims=True))
        mt_new = jnp.maximum(mt_ref[...], jnp.max(t, axis=1, keepdims=True))
        ax = jnp.exp(mx_ref[...] - mx_new)             # rescale factors
        at = jnp.exp(mt_ref[...] - mt_new)
        x_e = jnp.exp(x - mx_new)
        t_e = jnp.exp(t - mt_new)
        xs_ref[...] = ax * xs_ref[...] + jnp.sum(x_e, axis=1, keepdims=True)
        ts_ref[...] = at * ts_ref[...] + jnp.sum(t_e, axis=1, keepdims=True)
        w_ref[...] = at * w_ref[...] + jnp.sum(t_e * (t - x), axis=1,
                                               keepdims=True)
        mx_ref[...] = mx_new
        mt_ref[...] = mt_new

    @pl.when(jnp.logical_and(row_block_valid, j == n_j - 1))
    def _finalize_rows():
        # Per-row KL = W/Tt + log(X/Tt) + (m_x - m_t).  Garbage rows of a
        # partial block may be NaN/Inf; all reductions above are strictly
        # per-row so they cannot contaminate valid rows, and jnp.where below
        # discards them before accumulation.
        ts = ts_ref[...]
        row_kl = (w_ref[...] / ts
                  + jnp.log(xs_ref[...] / ts)
                  + (mx_ref[...] - mt_ref[...]))
        if needs_row_mask:   # compiled in only when N % tile_n != 0
            rows = lax.broadcasted_iota(jnp.int32, (tile_n, 1), 0) + start_row
            row_kl = jnp.where(rows < n_rows, row_kl, 0.0)
        acc_ref[...] += row_kl

    # Epilogue: one cross-sublane reduce + scale + lane-dense store per core.
    @pl.when(jnp.logical_and(i == n_i - 1, j == n_j - 1))
    def _epilogue():
        scale = (temp_factor * temp_factor) / n_rows
        total = jnp.sum(acc_ref[...]) * scale
        o_ref[...] = jnp.broadcast_to(total, o_ref.shape).astype(o_ref.dtype)


def kd_loss(inp, target, temp_factor, *, num_parallel=None,
            vmem_limit_bytes=None, max_tile_n=1024, max_tile_c=None):
    """KD loss = KLDiv(log_softmax(inp/T), softmax(tgt/T), 'sum') * T^2 / N.

    Note: temp_factor and the input shape are static -> each distinct
    (shape, dtype, T) combination compiles its own kernel.
    """
    assert inp.shape == target.shape and inp.ndim == 2
    n, num_classes = inp.shape
    itemsize = jnp.dtype(inp.dtype).itemsize
    # Sublane alignment: 8 rows for f32, 16 for bf16/fp16, 32 for int8.
    row_align = max(8, 32 // itemsize)

    if num_parallel is None:
        num_parallel = _default_num_parallel()
    if vmem_limit_bytes is None:
        vmem_limit_bytes = _vmem_budget_bytes()
    vmem_limit_bytes = int(vmem_limit_bytes)

    # Per-element footprint: 2 inputs x 2 pipeline buffers of the input dtype
    # plus ~7 live f32 temporaries in the streaming body.
    unit = 4 * itemsize + 7 * 4
    elems_budget = max(1, vmem_limit_bytes // unit)

    tile_c = _choose_tile_c(num_classes, row_align, elems_budget, max_tile_c)

    # Rows per block: biggest tile that fits the budget (includes the small
    # per-row scratch state, which pads to 128 lanes per (tile_n,1) buffer).
    bytes_per_row = tile_c * unit + 6 * 128 * 4
    tile_cap = max(row_align,
                   (vmem_limit_bytes // bytes_per_row) // row_align * row_align)
    per_core_rows = _round_up(pl.cdiv(n, num_parallel), row_align)
    tile_n = max(row_align, min(tile_cap, max_tile_n, per_core_rows))

    num_row_blocks = pl.cdiv(n, tile_n)
    blocks_per_core = pl.cdiv(num_row_blocks, num_parallel)
    num_class_blocks = pl.cdiv(num_classes, tile_c)

    needs_row_mask = (n % tile_n) != 0
    needs_col_mask = (tile_c < num_classes) and (num_classes % tile_c != 0)

    def in_map(c, i, j):
        # Clamp so logical row blocks past the end DMA a valid (fully
        # skipped) block instead of going out of bounds.
        return (jnp.minimum(c * blocks_per_core + i, num_row_blocks - 1), j)

    kernel = functools.partial(
        _kd_loss_kernel,
        temp_factor=float(temp_factor),
        n_rows=n,
        num_classes=num_classes,
        tile_n=tile_n,
        tile_c=tile_c,
        blocks_per_core=blocks_per_core,
        needs_row_mask=needs_row_mask,
        needs_col_mask=needs_col_mask,
    )

    out = pl.pallas_call(
        kernel,
        out_shape=jax.ShapeDtypeStruct((num_parallel * 8, 128), jnp.float32),
        grid_spec=pltpu.PrefetchScalarGridSpec(
            num_scalar_prefetch=0,
            grid=(num_parallel, blocks_per_core, num_class_blocks),
            in_specs=[
                pl.BlockSpec((tile_n, tile_c), in_map),
                pl.BlockSpec((tile_n, tile_c), in_map),
            ],
            out_specs=pl.BlockSpec((8, 128), lambda c, i, j: (c, 0)),
            scratch_shapes=[pltpu.VMEM((tile_n, 1), jnp.float32)] * 6,
        ),
        compiler_params=pltpu.CompilerParams(
            dimension_semantics=("parallel", "arbitrary", "arbitrary"),
            vmem_limit_bytes=vmem_limit_bytes,
        ),
    )(inp, target)

    # One broadcast partial per core (rows 0, 8, 16, ...) -> sum them.
    return jnp.sum(out[::8, 0])


def kd_loss_ref(inp, target, temp_factor):
    """Pure-JAX reference matching the PyTorch module."""
    t = float(temp_factor)
    log_p = jax.nn.log_softmax(inp.astype(jnp.float32) / t, axis=1)
    q = jax.nn.softmax(target.astype(jnp.float32) / t, axis=1)
    kl = jnp.sum(q * (jnp.log(q) - log_p))
    return kl * t * t / inp.shape[0]


if __name__ == "__main__":
    key = jax.random.PRNGKey(0)
    k1, k2, k3, k4, k5, k6 = jax.random.split(key, 6)

    # Test 1: small f32 logits (batch=16, classes=32), like the module's use.
    N, C, TEMP = 16, 32, 4.0
    student = jax.random.normal(k1, (N, C), dtype=jnp.float32)
    teacher = jax.random.normal(k2, (N, C), dtype=jnp.float32)
    loss = jax.block_until_ready(kd_loss(student, teacher, TEMP))
    ref = kd_loss_ref(student, teacher, TEMP)
    assert jnp.allclose(loss, ref, rtol=1e-5, atol=1e-5), (loss, ref)

    # Test 2: batch not divisible by the row tile (cdiv + row masking).
    N2, C2, TEMP2 = 10, 32, 2.0
    s2 = jax.random.normal(k3, (N2, C2), dtype=jnp.float32)
    t2 = jax.random.normal(k4, (N2, C2), dtype=jnp.float32)
    loss2 = jax.block_until_ready(kd_loss(s2, t2, TEMP2))
    ref2 = kd_loss_ref(s2, t2, TEMP2)
    assert jnp.allclose(loss2, ref2, rtol=1e-5, atol=1e-5), (loss2, ref2)

    # Test 3: bf16 inputs (halves HBM traffic on the mem-bound path); kernel
    # upcasts to f32, so compare against the f32 reference on the same values.
    sb = student.astype(jnp.bfloat16)
    tb = teacher.astype(jnp.bfloat16)
    loss3 = jax.block_until_ready(kd_loss(sb, tb, TEMP))
    ref3 = kd_loss_ref(sb, tb, TEMP)
    assert jnp.allclose(loss3, ref3, rtol=1e-5, atol=1e-5), (loss3, ref3)

    # Test 4: force class-axis streaming with a partial last class chunk
    # (C=320, tile_c=256) AND a partial row block (N=10) in the same call.
    N4, C4, TEMP4 = 10, 320, 3.0
    s4 = jax.random.normal(k5, (N4, C4), dtype=jnp.float32)
    t4 = jax.random.normal(k6, (N4, C4), dtype=jnp.float32)
    loss4 = jax.block_until_ready(kd_loss(s4, t4, TEMP4, max_tile_c=256))
    ref4 = kd_loss_ref(s4, t4, TEMP4)
    assert jnp.allclose(loss4, ref4, rtol=1e-5, atol=1e-5), (loss4, ref4)

    # Test 5: class streaming with an exact divisor tile (no column mask).
    N5, C5, TEMP5 = 16, 512, 2.5
    s5 = jax.random.normal(k1, (N5, C5), dtype=jnp.float32)
    t5 = jax.random.normal(k2, (N5, C5), dtype=jnp.float32)
    loss5 = jax.block_until_ready(kd_loss(s5, t5, TEMP5, max_tile_c=128))
    ref5 = kd_loss_ref(s5, t5, TEMP5)
    assert jnp.allclose(loss5, ref5, rtol=1e-5, atol=1e-5), (loss5, ref5)

    print("KERNEL_OK")
</pallas_src>

<mosaic_0001>
module attributes {stable_mosaic.version = 11 : i64} {
  func.func @_kd_loss_kernel(%arg0: i32, %arg1: i32, %arg2: i32, %arg3: memref<16x32xf32, #tpu.memory_space<vmem>>, %arg4: memref<16x32xf32, #tpu.memory_space<vmem>>, %arg5: memref<8x128xf32, #tpu.memory_space<vmem>>, %arg6: memref<16x1xf32, #tpu.memory_space<vmem>>, %arg7: memref<16x1xf32, #tpu.memory_space<vmem>>, %arg8: memref<16x1xf32, #tpu.memory_space<vmem>>, %arg9: memref<16x1xf32, #tpu.memory_space<vmem>>, %arg10: memref<16x1xf32, #tpu.memory_space<vmem>>, %arg11: memref<16x1xf32, #tpu.memory_space<vmem>>) attributes {dimension_semantics = [#tpu.dimension_semantics<parallel>, #tpu.dimension_semantics<arbitrary>, #tpu.dimension_semantics<arbitrary>], iteration_bounds = array<i64: 1, 1, 1>, scalar_prefetch = 0 : i64, scratch_operands = 6 : i64, tpu.core_type = #tpu.core_type<tc>, window_params = [{transform_indices = @transform_0, window_bounds = array<i64: 16, 32>}, {transform_indices = @transform_1, window_bounds = array<i64: 16, 32>}, {transform_indices = @transform_2, window_bounds = array<i64: 8, 128>}]} {
    %c1_i32 = arith.constant 1 : i32
    %0 = arith.muli %arg0, %c1_i32 : i32
    %1 = arith.addi %0, %arg1 : i32
    %c16_i32 = arith.constant 16 : i32
    %2 = arith.muli %1, %c16_i32 : i32
    %c16_i32_0 = arith.constant 16 : i32
    %3 = arith.cmpi slt, %2, %c16_i32_0 : i32
    %c0_i32 = arith.constant 0 : i32
    %4 = arith.cmpi eq, %arg1, %c0_i32 : i32
    %c0_i32_1 = arith.constant 0 : i32
    %5 = arith.cmpi eq, %arg2, %c0_i32_1 : i32
    %6 = arith.andi %4, %5 : i1
    %7 = arith.extui %6 : i1 to i32
    %c0_i32_2 = arith.constant 0 : i32
    %8 = arith.cmpi ne, %7, %c0_i32_2 : i32
    scf.if %8 {
      %cst = arith.constant 0.000000e+00 : f32
      %24 = vector.broadcast %cst : f32 to vector<16x1xf32>
      %c0 = arith.constant 0 : index
      %c0_11 = arith.constant 0 : index
      %25 = vector.load %arg11[%c0, %c0_11] : memref<16x1xf32, #tpu.memory_space<vmem>>, vector<16x1xf32>
      tpu.vector_store %arg11[%c0, %c0_11], %24 {strides = array<i32>} : memref<16x1xf32, #tpu.memory_space<vmem>>, vector<16x1xf32>,
    } else {
    }
    %c0_i32_3 = arith.constant 0 : i32
    %9 = arith.cmpi eq, %arg2, %c0_i32_3 : i32
    %10 = arith.andi %3, %9 : i1
    %11 = arith.extui %10 : i1 to i32
    %c0_i32_4 = arith.constant 0 : i32
    %12 = arith.cmpi ne, %11, %c0_i32_4 : i32
    scf.if %12 {
      %cst = arith.constant -1.000000e+30 : f32
      %24 = vector.broadcast %cst : f32 to vector<16x1xf32>
      %c0 = arith.constant 0 : index
      %c0_11 = arith.constant 0 : index
      %25 = vector.load %arg6[%c0, %c0_11] : memref<16x1xf32, #tpu.memory_space<vmem>>, vector<16x1xf32>
      tpu.vector_store %arg6[%c0, %c0_11], %24 {strides = array<i32>} : memref<16x1xf32, #tpu.memory_space<vmem>>, vector<16x1xf32>,
      %cst_12 = arith.constant -1.000000e+30 : f32
      %26 = vector.broadcast %cst_12 : f32 to vector<16x1xf32>
      %c0_13 = arith.constant 0 : index
      %c0_14 = arith.constant 0 : index
      %27 = vector.load %arg7[%c0_13, %c0_14] : memref<16x1xf32, #tpu.memory_space<vmem>>, vector<16x1xf32>
      tpu.vector_store %arg7[%c0_13, %c0_14], %26 {strides = array<i32>} : memref<16x1xf32, #tpu.memory_space<vmem>>, vector<16x1xf32>,
      %cst_15 = arith.constant 0.000000e+00 : f32
      %28 = vector.broadcast %cst_15 : f32 to vector<16x1xf32>
      %c0_16 = arith.constant 0 : index
      %c0_17 = arith.constant 0 : index
      %29 = vector.load %arg8[%c0_16, %c0_17] : memref<16x1xf32, #tpu.memory_space<vmem>>, vector<16x1xf32>
      tpu.vector_store %arg8[%c0_16, %c0_17], %28 {strides = array<i32>} : memref<16x1xf32, #tpu.memory_space<vmem>>, vector<16x1xf32>,
      %cst_18 = arith.constant 0.000000e+00 : f32
      %30 = vector.broadcast %cst_18 : f32 to vector<16x1xf32>
      %c0_19 = arith.constant 0 : index
      %c0_20 = arith.constant 0 : index
      %31 = vector.load %arg9[%c0_19, %c0_20] : memref<16x1xf32, #tpu.memory_space<vmem>>, vector<16x1xf32>
      tpu.vector_store %arg9[%c0_19, %c0_20], %30 {strides = array<i32>} : memref<16x1xf32, #tpu.memory_space<vmem>>, vector<16x1xf32>,
      %cst_21 = arith.constant 0.000000e+00 : f32
      %32 = vector.broadcast %cst_21 : f32 to vector<16x1xf32>
      %c0_22 = arith.constant 0 : index
      %c0_23 = arith.constant 0 : index
      %33 = vector.load %arg10[%c0_22, %c0_23] : memref<16x1xf32, #tpu.memory_space<vmem>>, vector<16x1xf32>
      tpu.vector_store %arg10[%c0_22, %c0_23], %32 {strides = array<i32>} : memref<16x1xf32, #tpu.memory_space<vmem>>, vector<16x1xf32>,
    } else {
    }
    %13 = arith.extui %3 : i1 to i32
    %c0_i32_5 = arith.constant 0 : i32
    %14 = arith.cmpi ne, %13, %c0_i32_5 : i32
    scf.if %14 {
      %c0 = arith.constant 0 : index
      %c0_11 = arith.constant 0 : index
      %24 = vector.load %arg3[%c0, %c0_11] : memref<16x32xf32, #tpu.memory_space<vmem>>, vector<16x32xf32>
      %cst = arith.constant 2.500000e-01 : f32
      %25 = vector.broadcast %cst : f32 to vector<16x32xf32>
      %26 = arith.mulf %24, %25 : vector<16x32xf32>
      %c0_12 = arith.constant 0 : index
      %c0_13 = arith.constant 0 : index
      %27 = vector.load %arg4[%c0_12, %c0_13] : memref<16x32xf32, #tpu.memory_space<vmem>>, vector<16x32xf32>
      %cst_14 = arith.constant 2.500000e-01 : f32
      %28 = vector.broadcast %cst_14 : f32 to vector<16x32xf32>
      %29 = arith.mulf %27, %28 : vector<16x32xf32>
      %c0_15 = arith.constant 0 : index
      %c0_16 = arith.constant 0 : index
      %30 = vector.load %arg6[%c0_15, %c0_16] : memref<16x1xf32, #tpu.memory_space<vmem>>, vector<16x1xf32>
      %cst_17 = arith.constant dense<0xFF800000> : vector<16xf32>
      %31 = vector.multi_reduction <maximumf>, %26, %cst_17 [1] : vector<16x32xf32> to vector<16xf32>
      %32 = vector.shape_cast %31 : vector<16xf32> to vector<16x1xf32>
      %33 = arith.maximumf %30, %32 : vector<16x1xf32>
      %c0_18 = arith.constant 0 : index
      %c0_19 = arith.constant 0 : index
      %34 = vector.load %arg7[%c0_18, %c0_19] : memref<16x1xf32, #tpu.memory_space<vmem>>, vector<16x1xf32>
      %cst_20 = arith.constant dense<0xFF800000> : vector<16xf32>
      %35 = vector.multi_reduction <maximumf>, %29, %cst_20 [1] : vector<16x32xf32> to vector<16xf32>
      %36 = vector.shape_cast %35 : vector<16xf32> to vector<16x1xf32>
      %37 = arith.maximumf %34, %36 : vector<16x1xf32>
      %c0_21 = arith.constant 0 : index
      %c0_22 = arith.constant 0 : index
      %38 = vector.load %arg6[%c0_21, %c0_22] : memref<16x1xf32, #tpu.memory_space<vmem>>, vector<16x1xf32>
      %39 = arith.subf %38, %33 : vector<16x1xf32>
      %40 = math.exp %39 : vector<16x1xf32>
      %c0_23 = arith.constant 0 : index
      %c0_24 = arith.constant 0 : index
      %41 = vector.load %arg7[%c0_23, %c0_24] : memref<16x1xf32, #tpu.memory_space<vmem>>, vector<16x1xf32>
      %42 = arith.subf %41, %37 : vector<16x1xf32>
      %43 = math.exp %42 : vector<16x1xf32>
      %44 = vector.broadcast %33 : vector<16x1xf32> to vector<16x32xf32>
      %45 = arith.subf %26, %44 : vector<16x32xf32>
      %46 = math.exp %45 : vector<16x32xf32>
      %47 = vector.broadcast %37 : vector<16x1xf32> to vector<16x32xf32>
      %48 = arith.subf %29, %47 : vector<16x32xf32>
      %49 = math.exp %48 : vector<16x32xf32>
      %c0_25 = arith.constant 0 : index
      %c0_26 = arith.constant 0 : index
      %50 = vector.load %arg8[%c0_25, %c0_26] : memref<16x1xf32, #tpu.memory_space<vmem>>, vector<16x1xf32>
      %51 = arith.mulf %40, %50 : vector<16x1xf32>
      %cst_27 = arith.constant dense<0.000000e+00> : vector<16xf32>
      %52 = vector.multi_reduction <add>, %46, %cst_27 [1] : vector<16x32xf32> to vector<16xf32>
      %53 = vector.shape_cast %52 : vector<16xf32> to vector<16x1xf32>
      %54 = arith.addf %51, %53 : vector<16x1xf32>
      %c0_28 = arith.constant 0 : index
      %c0_29 = arith.constant 0 : index
      %55 = vector.load %arg8[%c0_28, %c0_29] : memref<16x1xf32, #tpu.memory_space<vmem>>, vector<16x1xf32>
      tpu.vector_store %arg8[%c0_28, %c0_29], %54 {strides = array<i32>} : memref<16x1xf32, #tpu.memory_space<vmem>>, vector<16x1xf32>,
      %c0_30 = arith.constant 0 : index
      %c0_31 = arith.constant 0 : index
      %56 = vector.load %arg9[%c0_30, %c0_31] : memref<16x1xf32, #tpu.memory_space<vmem>>, vector<16x1xf32>
      %57 = arith.mulf %43, %56 : vector<16x1xf32>
      %cst_32 = arith.constant dense<0.000000e+00> : vector<16xf32>
      %58 = vector.multi_reduction <add>, %49, %cst_32 [1] : vector<16x32xf32> to vector<16xf32>
      %59 = vector.shape_cast %58 : vector<16xf32> to vector<16x1xf32>
      %60 = arith.addf %57, %59 : vector<16x1xf32>
      %c0_33 = arith.constant 0 : index
      %c0_34 = arith.constant 0 : index
      %61 = vector.load %arg9[%c0_33, %c0_34] : memref<16x1xf32, #tpu.memory_space<vmem>>, vector<16x1xf32>
      tpu.vector_store %arg9[%c0_33, %c0_34], %60 {strides = array<i32>} : memref<16x1xf32, #tpu.memory_space<vmem>>, vector<16x1xf32>,
      %c0_35 = arith.constant 0 : index
      %c0_36 = arith.constant 0 : index
      %62 = vector.load %arg10[%c0_35, %c0_36] : memref<16x1xf32, #tpu.memory_space<vmem>>, vector<16x1xf32>
      %63 = arith.mulf %43, %62 : vector<16x1xf32>
      %64 = arith.subf %29, %26 : vector<16x32xf32>
      %65 = arith.mulf %49, %64 : vector<16x32xf32>
      %cst_37 = arith.constant dense<0.000000e+00> : vector<16xf32>
      %66 = vector.multi_reduction <add>, %65, %cst_37 [1] : vector<16x32xf32> to vector<16xf32>
      %67 = vector.shape_cast %66 : vector<16xf32> to vector<16x1xf32>
      %68 = arith.addf %63, %67 : vector<16x1xf32>
      %c0_38 = arith.constant 0 : index
      %c0_39 = arith.constant 0 : index
      %69 = vector.load %arg10[%c0_38, %c0_39] : memref<16x1xf32, #tpu.memory_space<vmem>>, vector<16x1xf32>
      tpu.vector_store %arg10[%c0_38, %c0_39], %68 {strides = array<i32>} : memref<16x1xf32, #tpu.memory_space<vmem>>, vector<16x1xf32>,
      %c0_40 = arith.constant 0 : index
      %c0_41 = arith.constant 0 : index
      %70 = vector.load %arg6[%c0_40, %c0_41] : memref<16x1xf32, #tpu.memory_space<vmem>>, vector<16x1xf32>
      tpu.vector_store %arg6[%c0_40, %c0_41], %33 {strides = array<i32>} : memref<16x1xf32, #tpu.memory_space<vmem>>, vector<16x1xf32>,
      %c0_42 = arith.constant 0 : index
      %c0_43 = arith.constant 0 : index
      %71 = vector.load %arg7[%c0_42, %c0_43] : memref<16x1xf32, #tpu.memory_space<vmem>>, vector<16x1xf32>
      tpu.vector_store %arg7[%c0_42, %c0_43], %37 {strides = array<i32>} : memref<16x1xf32, #tpu.memory_space<vmem>>, vector<16x1xf32>,
    } else {
    }
    %c0_i32_6 = arith.constant 0 : i32
    %15 = arith.cmpi eq, %arg2, %c0_i32_6 : i32
    %16 = arith.andi %3, %15 : i1
    %17 = arith.extui %16 : i1 to i32
    %c0_i32_7 = arith.constant 0 : i32
    %18 = arith.cmpi ne, %17, %c0_i32_7 : i32
    scf.if %18 {
      %c0 = arith.constant 0 : index
      %c0_11 = arith.constant 0 : index
      %24 = vector.load %arg9[%c0, %c0_11] : memref<16x1xf32, #tpu.memory_space<vmem>>, vector<16x1xf32>
      %c0_12 = arith.constant 0 : index
      %c0_13 = arith.constant 0 : index
      %25 = vector.load %arg10[%c0_12, %c0_13] : memref<16x1xf32, #tpu.memory_space<vmem>>, vector<16x1xf32>
      %26 = arith.divf %25, %24 : vector<16x1xf32>
      %c0_14 = arith.constant 0 : index
      %c0_15 = arith.constant 0 : index
      %27 = vector.load %arg8[%c0_14, %c0_15] : memref<16x1xf32, #tpu.memory_space<vmem>>, vector<16x1xf32>
      %28 = arith.divf %27, %24 : vector<16x1xf32>
      %29 = math.log %28 : vector<16x1xf32>
      %30 = arith.addf %26, %29 : vector<16x1xf32>
      %c0_16 = arith.constant 0 : index
      %c0_17 = arith.constant 0 : index
      %31 = vector.load %arg6[%c0_16, %c0_17] : memref<16x1xf32, #tpu.memory_space<vmem>>, vector<16x1xf32>
      %c0_18 = arith.constant 0 : index
      %c0_19 = arith.constant 0 : index
      %32 = vector.load %arg7[%c0_18, %c0_19] : memref<16x1xf32, #tpu.memory_space<vmem>>, vector<16x1xf32>
      %33 = arith.subf %31, %32 : vector<16x1xf32>
      %34 = arith.addf %30, %33 : vector<16x1xf32>
      %c0_20 = arith.constant 0 : index
      %c0_21 = arith.constant 0 : index
      %35 = vector.load %arg11[%c0_20, %c0_21] : memref<16x1xf32, #tpu.memory_space<vmem>>, vector<16x1xf32>
      %36 = arith.addf %35, %34 : vector<16x1xf32>
      %c0_22 = arith.constant 0 : index
      %c0_23 = arith.constant 0 : index
      %37 = vector.load %arg11[%c0_22, %c0_23] : memref<16x1xf32, #tpu.memory_space<vmem>>, vector<16x1xf32>
      tpu.vector_store %arg11[%c0_22, %c0_23], %36 {strides = array<i32>} : memref<16x1xf32, #tpu.memory_space<vmem>>, vector<16x1xf32>,
    } else {
    }
    %c0_i32_8 = arith.constant 0 : i32
    %19 = arith.cmpi eq, %arg1, %c0_i32_8 : i32
    %c0_i32_9 = arith.constant 0 : i32
    %20 = arith.cmpi eq, %arg2, %c0_i32_9 : i32
    %21 = arith.andi %19, %20 : i1
    %22 = arith.extui %21 : i1 to i32
    %c0_i32_10 = arith.constant 0 : i32
    %23 = arith.cmpi ne, %22, %c0_i32_10 : i32
    scf.if %23 {
      %c0 = arith.constant 0 : index
      %c0_11 = arith.constant 0 : index
      %24 = vector.load %arg11[%c0, %c0_11] : memref<16x1xf32, #tpu.memory_space<vmem>>, vector<16x1xf32>
      %25 = vector.shape_cast %24 : vector<16x1xf32> to vector<1x16x1xf32>
      %cst = arith.constant dense<0.000000e+00> : vector<1xf32>
      %26 = vector.multi_reduction <add>, %25, %cst [1, 2] : vector<1x16x1xf32> to vector<1xf32>
      %27 = vector.shape_cast %26 : vector<1xf32> to vector<1x1x1xf32>
      %28 = vector.extract %27[0, 0, 0] : f32 from vector<1x1x1xf32>
      %cst_12 = arith.constant 1.000000e+00 : f32
      %29 = arith.mulf %28, %cst_12 : f32
      %30 = vector.broadcast %29 : f32 to vector<8x128xf32>
      %c0_13 = arith.constant 0 : index
      %c0_14 = arith.constant 0 : index
      %31 = vector.load %arg5[%c0_13, %c0_14] : memref<8x128xf32, #tpu.memory_space<vmem>>, vector<8x128xf32>
      tpu.vector_store %arg5[%c0_13, %c0_14], %30 {strides = array<i32>} : memref<8x128xf32, #tpu.memory_space<vmem>>, vector<8x128xf32>,
    } else {
    }
    return
  }
  func.func @transform_0(%arg0: i32, %arg1: i32, %arg2: i32) -> (i32, i32) {
    %c1_i32 = arith.constant 1 : i32
    %0 = arith.muli %arg0, %c1_i32 : i32
    %1 = arith.addi %0, %arg1 : i32
    %c0_i32 = arith.constant 0 : i32
    %2 = arith.minsi %1, %c0_i32 : i32
    %c0_i32_0 = arith.constant 0 : i32
    return %2, %arg2 : i32, i32
  }
  func.func @transform_1(%arg0: i32, %arg1: i32, %arg2: i32) -> (i32, i32) {
    %c1_i32 = arith.constant 1 : i32
    %0 = arith.muli %arg0, %c1_i32 : i32
    %1 = arith.addi %0, %arg1 : i32
    %c0_i32 = arith.constant 0 : i32
    %2 = arith.minsi %1, %c0_i32 : i32
    %c0_i32_0 = arith.constant 0 : i32
    return %2, %arg2 : i32, i32
  }
  func.func @transform_2(%arg0: i32, %arg1: i32, %arg2: i32) -> (i32, i32) {
    %c0_i32 = arith.constant 0 : i32
    %c0_i32_0 = arith.constant 0 : i32
    return %arg0, %c0_i32 : i32, i32
  }
}

</mosaic_0001>

<bundles_post_ra>
// kernel: tpu_custom_call.1
= control target key start
LH: loop header
LB: loop body
LE: loop exit
PB: predicated region body
PF: predicated region fallthrough
CT: control target
= control target key end

     0   :  { %7 = vsyncpa [#allocation9], 0  ;;  %s511_s0 = inlined_call_operand.hbm [shape: f32[16,32], index: 0, kind: input, shape index: {}]   ;;  %s512_s1 = inlined_call_operand.hbm [shape: f32[16,32], index: 1, kind: input, shape index: {}]   ;;  %s513_s2 = inlined_call_operand.hbm [shape: f32[8,128], index: 2, kind: output, shape index: {}]  }
   0x1   :  { %8 = vsyncpa [#allocation12], 0 }
   0x2   :  { %9 = vsyncpa [#allocation10], 0  ;;  %s396_s9 = smov [#allocation8]   ;;  %s324_s13 = scalar_lea.hbm %s511_s0, 256 }
   0x3   :  { %s21_s10 = sshll.u32 %s396_s9, 4  ;;  %p325_p0 = scmp.ne.s32.totalorder %s511_s0, %s324_s13  ;;  %s22_s10 = int_to_ptr.vmem [resolvable:$true] %s21_s10 }
   0x4   :  { %p328_p1 = scmp.lt.u32.totalorder %s324_s13, %s511_s0 }
   0x6   :  { %p330_p2 = pnand %p328_p1, %p325_p0 }
   0x8   :  { %333 = shalt.err (!%p330_p2)
}
   0x9   :  { %s334_s18 = scalar_lea.vmem %s22_s10, 256  ;;  %p339_p4 = scmp.lt.s32.totalorder %s22_s10, %s22_s10 }
   0xa   :  { %p335_p3 = scmp.ne.s32.totalorder %s22_s10, %s334_s18  ;;  %p340_p5 = scmp.lt.s32.totalorder %s334_s18, %s334_s18 }
   0xc   :  { %p341_p6 = por %p340_p5, %p339_p4 }
   0xe   :  { %p342_p7 = pnand %p341_p6, %p335_p3 }
  0x10   :  { %345 = shalt.err (!%p342_p7)
}
  0x11   :  { %s397_s19 = smov 128   ;;  %s398_s20 = smov 8  }
  0x12   :  { %27 = dma.hbm_to_vmem [thread:$0]  %s511_s0, 256, %s22_s10, [#allocation9], %s397_s19, %s397_s19, %s398_s20  }
  0x13   :  { %s399_s23 = smov [#allocation11]   ;;  %s346_s27 = scalar_lea.hbm %s512_s1, 256 }
  0x14   :  { %s39_s24 = sshll.u32 %s399_s23, 4  ;;  %p347_p8 = scmp.ne.s32.totalorder %s512_s1, %s346_s27  ;;  %s40_s24 = int_to_ptr.vmem [resolvable:$true] %s39_s24 }
  0x15   :  { %p350_p9 = scmp.lt.u32.totalorder %s346_s27, %s512_s1 }
  0x17   :  { %p352_p10 = pnand %p350_p9, %p347_p8 }
  0x19   :  { %355 = shalt.err (!%p352_p10)
}
  0x1a   :  { %s356_s4 = scalar_lea.vmem %s40_s24, 256  ;;  %p361_p12 = scmp.lt.s32.totalorder %s40_s24, %s40_s24 }
  0x1b   :  { %p357_p11 = scmp.ne.s32.totalorder %s40_s24, %s356_s4  ;;  %p362_p13 = scmp.lt.s32.totalorder %s356_s4, %s356_s4 }
  0x1d   :  { %p363_p0 = por %p362_p13, %p361_p12 }
  0x1f   :  { %p364_p1 = pnand %p363_p0, %p357_p11 }
  0x21   :  { %367 = shalt.err (!%p364_p1)
}
  0x22   :  { %45 = dma.hbm_to_vmem [thread:$0]  %s512_s1, 256, %s40_s24, [#allocation12], %s397_s19, %s397_s19, %s398_s20  }
  0x23   :  { %390 = dma.done.wait [#allocation9], 256  }
  0x24   :  { %391 = vsyncadd [#allocation9], 4294967040 }
  0x25   :  { %392 = dma.done.wait [#allocation12], 256  }
  0x26   :  { %393 = vsyncadd [#allocation12], 4294967040  ;;  %vm69_vm0 = vcmask 7168   ;;  %v400_v0 = vmov -1e+30   ;;  %v94_v1 = vld [vmem:[#allocation11] sm:$0xff] }
  0x27   :  { %79 = vst.msk [vmem:[#allocation3] sm:$0xff] %vm69_vm0, %v400_v0  ;;  %77 = vst.msk [vmem:[#allocation2] sm:$0xff] %vm69_vm0, %v400_v0  ;;  %vm100_vm1 = vcmask 261120   ;;  %v90_v2 = vld [vmem:[#allocation8] sm:$0xff]  ;;  %v95_v3 = vld [vmem:[#allocation11 + $0x8] sm:$0xff]  ;;  %v447_v4 = vmul.f32 0.25, %v94_v1 }
  0x28   :  { %78 = vst.msk [vmem:[#allocation2 + $0x8] sm:$0xff] %vm69_vm0, %v400_v0  ;;  %80 = vst.msk [vmem:[#allocation3 + $0x8] sm:$0xff] %vm69_vm0, %v400_v0  ;;  %v449_v5 = vmul.f32 0.25, %v90_v2  ;;  %v451_v6 = vmul.f32 0.25, %v95_v3  ;;  %v91_v7 = vld [vmem:[#allocation8 + $0x8] sm:$0xff]  ;;  %v401_v13 = vmov 0  }
  0x29   :  { %v453_v8 = vmul.f32 0.25, %v91_v7  ;;  %v111_v9 = vsel %vm100_vm1, %v447_v4, -inf  ;;  %298 = vset.pattern.permute.xlu0 %v401_v13  ;;  %299 = vset.pattern.permute.xlu1 %v401_v13  ;;  %v402_v14 = vmov 0.0   ;;  %s403_s1 = smov [#allocation13]  }
  0x2a   :  { %v101_v10 = vsel %vm100_vm1, %v449_v5, -inf  ;;  %112 = vmax.xlane.f32.xlu0 %v111_v9  ;;  %v114_v11 = vsel %vm100_vm1, %v451_v6, -inf  ;;  %83 = vst.msk [vmem:[#allocation5] sm:$0xff] %vm69_vm0, %v402_v14  ;;  %70 = vst.msk [vmem:[#allocation7] sm:$0xff] %vm69_vm0, %v402_v14  ;;  %v196_v49 = vsub.f32 %v447_v4, %v449_v5  ;;  %s274_s6 = sshll.u32 %s403_s1, 4  ;;  %s275_s6 = int_to_ptr.vmem [resolvable:$true] %s274_s6 }
  0x2b   :  { %102 = vmax.xlane.f32.xlu1 %v101_v10  ;;  %v104_v12 = vsel %vm100_vm1, %v453_v8, -inf  ;;  %71 = vst.msk [vmem:[#allocation7 + $0x8] sm:$0xff] %vm69_vm0, %v402_v14  ;;  %81 = vst.msk [vmem:[#allocation4] sm:$0xff] %vm69_vm0, %v402_v14  ;;  %v197_v53 = vsub.f32 %v451_v6, %v453_v8  ;;  %s368_s8 = scalar_lea.vmem %s275_s6, 128  ;;  %p373_p3 = scmp.lt.s32.totalorder %s275_s6, %s275_s6 }
  0x2c   :  { %82 = vst.msk [vmem:[#allocation4 + $0x8] sm:$0xff] %vm69_vm0, %v402_v14  ;;  %84 = vst.msk [vmem:[#allocation5 + $0x8] sm:$0xff] %vm69_vm0, %v402_v14  ;;  %p369_p2 = scmp.ne.s32.totalorder %s275_s6, %s368_s8  ;;  %p374_p4 = scmp.lt.s32.totalorder %s368_s8, %s368_s8 }
  0x2d   :  { %85 = vst.msk [vmem:[#allocation6] sm:$0xff] %vm69_vm0, %v402_v14  ;;  %86 = vst.msk [vmem:[#allocation6 + $0x8] sm:$0xff] %vm69_vm0, %v402_v14 }
  0x2e   :  { %115 = vmax.xlane.f32.xlu0 %v114_v11  ;;  %v109_v15 = vld [vmem:[#allocation3] sm:$0xff]  ;;  %v98_v16 = vld [vmem:[#allocation2] sm:$0xff]  ;;  %p375_p5 = por %p374_p4, %p373_p3 }
  0x2f   :  { %105 = vmax.xlane.f32.xlu1 %v104_v12  ;;  %v110_v21 = vld [vmem:[#allocation3 + $0x8] sm:$0xff]  ;;  %v99_v22 = vld [vmem:[#allocation2 + $0x8] sm:$0xff] }
  0x30   :  { %p376_p6 = pnand %p375_p5, %p369_p2 }
  0x31   :  { %v178_v62 = vld [vmem:[#allocation5] sm:$0xff] }
  0x32   :  { %v163_v7 = vld [vmem:[#allocation4] sm:$0xff] }
  0x33   :  { %v179_v2 = vld [vmem:[#allocation5 + $0x8] sm:$0xff]  ;;  %v164_v12 = vld [vmem:[#allocation4 + $0x8] sm:$0xff] }
  0xb7   :  { %v113_v17 = vpop.xlane.xlu0 %112 }
  0xb8   :  { %v103_v18 = vpop.xlane.xlu1 %102  ;;  %v117_v19 = vmax.f32 %v109_v15, %v113_v17  ;;  %v192_v17 = vld [vmem:[#allocation6] sm:$0xff] }
  0xb9   :  { %v107_v20 = vmax.f32 %v98_v16, %v103_v18 }
  0xba   :  { %v125_v23 = vsub.f32 %v109_v15, %v117_v19  ;;  %212 = vst.msk [vmem:[#allocation3] sm:$0xff] %vm69_vm0, %v117_v19  ;;  %149 = vperm.xlu0 %298, %v117_v19  }
  0xbb   :  { %v119_v24 = vsub.f32 %v98_v16, %v107_v20  ;;  %210 = vst.msk [vmem:[#allocation2] sm:$0xff] %vm69_vm0, %v107_v20  ;;  %v116_v25 = vpop.xlane.xlu0 %115 }
  0xbc   :  { %v106_v26 = vpop.xlane.xlu1 %105  ;;  %v118_v27 = vmax.f32 %v110_v21, %v116_v25  ;;  %v127_v57 = vmul.f32 1.442695, %v125_v23 }
  0xbd   :  { %v108_v28 = vmax.f32 %v99_v22, %v106_v26  ;;  %v121_v59 = vmul.f32 1.442695, %v119_v24 }
  0xbe   :  { %v126_v29 = vsub.f32 %v110_v21, %v118_v27  ;;  %213 = vst.msk [vmem:[#allocation3 + $0x8] sm:$0xff] %vm69_vm0, %v118_v27  ;;  %154 = vperm.xlu1 %299, %v118_v27  }
  0xbf   :  { %v120_v30 = vsub.f32 %v99_v22, %v108_v28  ;;  %211 = vst.msk [vmem:[#allocation2 + $0x8] sm:$0xff] %vm69_vm0, %v108_v28  ;;  %v193_v22 = vld [vmem:[#allocation6 + $0x8] sm:$0xff] }
  0xc0   :  { %v129_v58 = vmul.f32 1.442695, %v126_v29 }
  0xc1   :  { %v123_v60 = vmul.f32 1.442695, %v120_v30 }
  0xc2   :  { %133 = vperm.xlu1 %299, %v107_v20  }
  0xc6   :  { %138 = vperm.xlu1 %299, %v108_v28  }
 0x139   :  { %v150_v31 = vpop.permute.xlu0 %149 }
 0x13a   :  { %v157_v32 = vsub.f32 %v447_v4, %v150_v31 }
 0x13c   :  { %v159_v33 = vmul.f32 1.442695, %v157_v32 }
 0x13d   :  { %v155_v34 = vpop.permute.xlu1 %154 }
 0x13e   :  { %300 = vpow2.f32 %v159_v33  ;;  %v158_v35 = vsub.f32 %v451_v6, %v155_v34 }
 0x140   :  { %v161_v36 = vmul.f32 1.442695, %v158_v35  ;;  %v236_v35 = vld [vmem:[#allocation3] sm:$0xff] }
 0x141   :  { %v134_v37 = vpop.permute.xlu1 %133 }
 0x142   :  { %302 = vpow2.f32 %v161_v36  ;;  %v141_v38 = vsub.f32 %v449_v5, %v134_v37  ;;  %v234_v36 = vld [vmem:[#allocation2] sm:$0xff] }
 0x144   :  { %v143_v39 = vmul.f32 1.442695, %v141_v38 }
 0x145   :  { %v139_v40 = vpop.permute.xlu1 %138 }
 0x146   :  { %304 = vpow2.f32 %v143_v39  ;;  %v142_v41 = vsub.f32 %v453_v8, %v139_v40  ;;  %v238_v40 = vsub.f32 %v234_v36, %v236_v35 }
 0x148   :  { %v301_v42 = vpop.eup %300  ;;  %v145_v43 = vmul.f32 1.442695, %v142_v41 }
 0x149   :  { %v182_v44 = vsel %vm100_vm1, %v301_v42, 0.0  ;;  %v198_v52 = vmul.f32 %v301_v42, %v196_v49 }
 0x14a   :  { %306 = vpow2.f32 %v145_v43  ;;  %183 = vadd.xlane.f32.xlu1 %v182_v44  ;;  %v237_v43 = vld [vmem:[#allocation3 + $0x8] sm:$0xff]  ;;  %v235_v44 = vld [vmem:[#allocation2 + $0x8] sm:$0xff] }
 0x14b   :  { %v200_v54 = vsel %vm100_vm1, %v198_v52, 0.0  ;;  %308 = vpow2.f32 %v127_v57  ;;  %v239_v49 = vsub.f32 %v235_v44, %v237_v43  ;;  %v243_v52 = vld [vmem:[#allocation7 + $0x8] sm:$0xff] }
 0x14c   :  { %v303_v45 = vpop.eup %302  ;;  %310 = vpow2.f32 %v129_v58 }
 0x14d   :  { %v185_v46 = vsel %vm100_vm1, %v303_v45, 0.0  ;;  %v199_v55 = vmul.f32 %v303_v45, %v197_v53  ;;  %312 = vpow2.f32 %v121_v59  ;;  %v242_v45 = vld [vmem:[#allocation7] sm:$0xff] }
 0x14e   :  { %186 = vadd.xlane.f32.xlu0 %v185_v46  ;;  %314 = vpow2.f32 %v123_v60 }
 0x14f   :  { %v203_v56 = vsel %vm100_vm1, %v199_v55, 0.0 }
 0x150   :  { %v305_v47 = vpop.eup %304 }
 0x151   :  { %v167_v48 = vsel %vm100_vm1, %v305_v47, 0.0 }
 0x152   :  { %168 = vadd.xlane.f32.xlu1 %v167_v48 }
 0x154   :  { %v307_v50 = vpop.eup %306 }
 0x155   :  { %v170_v51 = vsel %vm100_vm1, %v307_v50, 0.0  ;;  %v309_v61 = vpop.eup %308 }
 0x156   :  { %171 = vadd.xlane.f32.xlu1 %v170_v51  ;;  %v180_v63 = vmul.f32 %v309_v61, %v178_v62  ;;  %v311_v0 = vpop.eup %310  ;;  %v194_v20 = vmul.f32 %v309_v61, %v192_v17 }
 0x157   :  { %v181_v4 = vmul.f32 %v311_v0, %v179_v2  ;;  %v313_v5 = vpop.eup %312  ;;  %v195_v24 = vmul.f32 %v311_v0, %v193_v22 }
 0x158   :  { %v165_v9 = vmul.f32 %v313_v5, %v163_v7  ;;  %v315_v10 = vpop.eup %314 }
 0x159   :  { %v166_v15 = vmul.f32 %v315_v10, %v164_v12 }
 0x15a   :  { %201 = vadd.xlane.f32.xlu1 %v200_v54 }
 0x15e   :  { %204 = vadd.xlane.f32.xlu1 %v203_v56 }
 0x1d7   :  { %v184_v1 = vpop.xlane.xlu1 %183 }
 0x1d8   :  { %v188_v3 = vadd.f32 %v184_v1, %v180_v63 }
 0x1da   :  { %190 = vst.msk [vmem:[#allocation5] sm:$0xff] %vm69_vm0, %v188_v3 }
 0x1db   :  { %v187_v6 = vpop.xlane.xlu0 %186 }
 0x1dc   :  { %v189_v8 = vadd.f32 %v187_v6, %v181_v4 }
 0x1de   :  { %191 = vst.msk [vmem:[#allocation5 + $0x8] sm:$0xff] %vm69_vm0, %v189_v8 }
 0x1df   :  { %v169_v11 = vpop.xlane.xlu1 %168 }
 0x1e0   :  { %v173_v13 = vadd.f32 %v169_v11, %v165_v9 }
 0x1e1   :  { %v216_v14 = vld [vmem:[#allocation5] sm:$0xff] }
 0x1e2   :  { %316 = vrcp.f32 %v216_v14  ;;  %176 = vst.msk [vmem:[#allocation4] sm:$0xff] %vm69_vm0, %v173_v13 }
 0x1e3   :  { %v172_v16 = vpop.xlane.xlu1 %171 }
 0x1e4   :  { %v174_v18 = vadd.f32 %v172_v16, %v166_v15 }
 0x1e5   :  { %v217_v19 = vld [vmem:[#allocation5 + $0x8] sm:$0xff] }
 0x1e6   :  { %318 = vrcp.f32 %v217_v19  ;;  %177 = vst.msk [vmem:[#allocation4 + $0x8] sm:$0xff] %vm69_vm0, %v174_v18 }
 0x1e7   :  { %v202_v21 = vpop.xlane.xlu1 %201 }
 0x1e8   :  { %v206_v23 = vadd.f32 %v202_v21, %v194_v20 }
 0x1e9   :  { %v224_v27 = vld [vmem:[#allocation4] sm:$0xff] }
 0x1ea   :  { %208 = vst.msk [vmem:[#allocation6] sm:$0xff] %vm69_vm0, %v206_v23 }
 0x1eb   :  { %v205_v25 = vpop.xlane.xlu1 %204 }
 0x1ec   :  { %v317_v26 = vpop.eup %316  ;;  %v207_v28 = vadd.f32 %v205_v25, %v195_v24 }
 0x1ed   :  { %v226_v29 = vmul.f32 %v317_v26, %v224_v27  ;;  %v225_v31 = vld [vmem:[#allocation4 + $0x8] sm:$0xff] }
 0x1ee   :  { %209 = vst.msk [vmem:[#allocation6 + $0x8] sm:$0xff] %vm69_vm0, %v207_v28 }
 0x1ef   :  { %320 = vlog2.f32 %v226_v29 }
 0x1f0   :  { %v319_v30 = vpop.eup %318 }
 0x1f1   :  { %v227_v32 = vmul.f32 %v319_v30, %v225_v31  ;;  %v218_v33 = vld [vmem:[#allocation6] sm:$0xff] }
 0x1f2   :  { %v221_v38 = vmul.f32 %v317_v26, %v218_v33 }
 0x1f3   :  { %322 = vlog2.f32 %v227_v32 }
 0x1f5   :  { %v219_v39 = vld [vmem:[#allocation6 + $0x8] sm:$0xff] }
 0x1f6   :  { %v223_v47 = vmul.f32 %v319_v30, %v219_v39 }
 0x1f9   :  { %v321_v34 = vpop.eup %320 }
 0x1fa   :  { %v229_v37 = vmul.f32 0.6931472, %v321_v34 }
 0x1fc   :  { %v232_v41 = vadd.f32 %v229_v37, %v221_v38 }
 0x1fd   :  { %v323_v42 = vpop.eup %322 }
 0x1fe   :  { %v231_v46 = vmul.f32 0.6931472, %v323_v42  ;;  %v240_v48 = vadd.f32 %v238_v40, %v232_v41 }
 0x200   :  { %v233_v50 = vadd.f32 %v231_v46, %v223_v47  ;;  %v244_v51 = vadd.f32 %v242_v45, %v240_v48 }
 0x202   :  { %v241_v53 = vadd.f32 %v239_v49, %v233_v50  ;;  %247 = vst.msk [vmem:[#allocation7] sm:$0xff] %vm69_vm0, %v244_v51 }
 0x204   :  { %v245_v54 = vadd.f32 %v243_v52, %v241_v53 }
 0x206   :  { %248 = vst.msk [vmem:[#allocation7 + $0x8] sm:$0xff] %vm69_vm0, %v245_v54 }
 0x209   :  { %v251_v55 = vld [vmem:[#allocation7] sm:$0xff] }
 0x20a   :  { %v254_v57 = vsel %vm69_vm0, %v251_v55, 0.0 }
 0x20d   :  { %v252_v56 = vld [vmem:[#allocation7 + $0x8] sm:$0xff] }
 0x20e   :  { %v255_v58 = vsel %vm69_vm0, %v252_v56, 0.0 }
 0x20f   :  { %v256_v59 = vadd.f32 %v255_v58, %v254_v57 }
 0x211   :  { %257 = vadd.xlane.f32.xlu0 %v256_v59 }
 0x29e   :  { %v258_v60 = vpop.xlane.xlu0 %257 }
 0x29f   :  { %v259_v61 = vrot.slane %v258_v60, 4 }
 0x2a1   :  { %v260_v62 = vadd.f32 %v259_v61, %v258_v60 }
 0x2a3   :  { %v261_v63 = vrot.slane %v260_v62, 2 }
 0x2a5   :  { %v262_v0 = vadd.f32 %v261_v63, %v260_v62 }
 0x2a7   :  { %v263_v1 = vrot.slane %v262_v0, 1 }
 0x2a9   :  { %v264_v2 = vadd.f32 %v263_v1, %v262_v0 }
 0x2ab   :  { %288 = vpush %v264_v2 }
 0x2dc   :  { %s289_s7 = spop %288 }
 0x2dd   :  { %v266_v3 = vstv %s289_s7 }
 0x2de   :  { %267 = vst [vmem:[#allocation13] sm:$0xff] %v266_v3 }
 0x2df   :  { %379 = shalt.err (!%p376_p6)
}
 0x2e0   :  { %s380_s11 = scalar_lea.hbm %s513_s2, 128 }
 0x2e1   :  { %p381_p7 = scmp.ne.s32.totalorder %s513_s2, %s380_s11  ;;  %p384_p8 = scmp.lt.u32.totalorder %s380_s11, %s513_s2 }
 0x2e3   :  { %p386_p9 = pnand %p384_p8, %p381_p7 }
 0x2e5   :  { %389 = shalt.err (!%p386_p9)
}
 0x2e6   :  { %277 = dma.vmem_to_hbm [thread:$0]  %s275_s6, 128, %s513_s2, [#allocation10]  }
 0x2e7   :  { %394 = dma.done.wait [#allocation10], 128  }
 0x2e8   :  { %395 = vsyncadd [#allocation10], 4294967168 }
 0x2e9   :  { %281 = vsyncpa [#allocation9], 1 }
 0x2ea   :  { %282 = vsyncpa [#allocation12], 1 }
 0x2eb   :  { %283 = vsyncpa [#allocation10], 1 }

</bundles_post_ra>
